<compile_context>
chip_gen: v7x
topology: tpu7x:2x2x1
jax: 0.10.0
libtpu: 0.0.40
codegen_flags: <defaults>
</compile_context>

<pallas_src>
import functools
import math

import jax
import jax.numpy as jnp
from jax.experimental import pallas as pl
from jax.experimental.pallas import tpu as pltpu


_EPS = 1e-12                 # F.normalize default eps
_EPS_SQ = _EPS * _EPS
_CLASS_ALIGN = 512           # padded class count is a multiple of the max class tile
_FEAT_ALIGN = 128            # lane alignment for the feature (contraction) axis
_MIB = 1024 * 1024


def _round_up(n, m):
    return ((n + m - 1) // m) * m


@functools.lru_cache(maxsize=1)
def _hw_config():
    """Per-generation (vmem_budget, vmem_limit, batch_tile_cap, num_tensorcores_hint)."""
    try:
        vmem_cap = int(pltpu.get_tpu_info().vmem_capacity_bytes)
    except Exception:
        vmem_cap = 64 * _MIB
    kind = ""
    try:
        kind = jax.devices()[0].device_kind.lower()
    except Exception:
        pass
    if vmem_cap >= 96 * _MIB:
        # v5e / v6e: 128 MiB physical VMEM.
        budget, limit = 64 * _MIB, 100 * _MIB
        # v5e ridge ~240 flop/B -> tb=256 suffices; v6e ridge ~650 -> tb up to 1024.
        tb_cap = 256 if "v5" in kind else 1024
        n_tc = 1
    else:
        # v7x-like: 64 MiB physical VMEM, 2 TensorCores, ridge ~310 flop/B.
        budget, limit = 32 * _MIB, 48 * _MIB
        tb_cap = 512
        n_tc = 2
    return budget, limit, tb_cap, n_tc


# ---------------------------------------------------------------------------
# Kernel 1: one-time row L2-normalization of the (padded) weight matrix.
# Runs once per weight update; amortized over every forward call.
# ---------------------------------------------------------------------------
def _l2_normalize_rows_kernel(w_ref, o_ref):
    w = w_ref[...].astype(jnp.float32)                      # norm math in f32
    sumsq = jnp.sum(w * w, axis=-1, keepdims=True)
    inv = jax.lax.rsqrt(jnp.maximum(sumsq, _EPS_SQ))        # == 1 / max(||w||, eps)
    o_ref[...] = (w * inv).astype(o_ref.dtype)


def l2_normalize_rows(w, out_dtype, *, row_tile=512):
    """Row-wise L2 normalization of w:(R,F) -> (R,F) in out_dtype (Pallas kernel)."""
    r, f = w.shape
    budget, limit, _, _ = _hw_config()
    in_b = w.dtype.itemsize
    out_b = jnp.dtype(out_dtype).itemsize
    tr = r if r <= row_tile else row_tile
    while (2 * tr * f * (in_b + out_b) + tr * f * 4) > budget and tr > 8:
        tr = max(8, (tr // 2) // 8 * 8)

    return pl.pallas_call(
        _l2_normalize_rows_kernel,
        out_shape=jax.ShapeDtypeStruct((r, f), out_dtype),
        grid=(pl.cdiv(r, tr),),
        in_specs=[pl.BlockSpec((tr, f), lambda i: (i, 0))],
        out_specs=pl.BlockSpec((tr, f), lambda i: (i, 0)),
        compiler_params=pltpu.CompilerParams(
            dimension_semantics=("parallel",),
            vmem_limit_bytes=limit,
        ),
    )(w)


def prepare_normalized_weight(W, matmul_dtype=jnp.bfloat16):
    """Pad classes to a multiple of 512 and features to a multiple of 128, L2-normalize
    rows once, and transpose to K-major (F_pad, C_pad).  One-time cost; cache while W is
    fixed.  Padded rows/columns are zeros: they change no norm and produce zero logits."""
    C, F = W.shape
    C_pad = _round_up(C, _CLASS_ALIGN)
    F_pad = _round_up(F, _FEAT_ALIGN)
    W_pad = jnp.pad(W, ((0, C_pad - C), (0, F_pad - F)))
    Wn = l2_normalize_rows(W_pad, matmul_dtype)
    return jnp.transpose(Wn)                                # (F_pad, C_pad)


# ---------------------------------------------------------------------------
# Kernel 2: hot path -- fused  s * (normalize(x) @ Wn.T).
#   s_ref  : (1,)        SMEM scalar (scalar prefetch)
#   x_ref  : (tb, F_pad) raw activations (resident across the class axis)
#   wn_ref : (F_pad, tc) pre-normalized, K-major weights (bf16 or f32)
#   o_ref  : (tb, tc)    f32 scaled cosine logits
#   xn_ref : (tb, F_pad) VMEM scratch holding the normalized x tile
# ---------------------------------------------------------------------------
def _scaled_cosine_kernel(s_ref, x_ref, wn_ref, o_ref, xn_ref):
    # Normalize the x tile once per batch tile (j == 0) and reuse it for every class
    # tile: the class axis is the inner, sequential ("arbitrary") grid axis.
    @pl.when(pl.program_id(1) == 0)
    def _():
        x = x_ref[...].astype(jnp.float32)
        sumsq = jnp.sum(x * x, axis=-1, keepdims=True)
        inv = jax.lax.rsqrt(jnp.maximum(sumsq, _EPS_SQ))    # == 1 / max(||x||, eps)
        xn_ref[...] = (x * inv).astype(xn_ref.dtype)

    acc = jnp.dot(xn_ref[...], wn_ref[...], preferred_element_type=jnp.float32)
    o_ref[...] = s_ref[0] * acc          # fused scale: free VPU filler under the MXU


def scaled_cosine_logits(x, wn_t, n_classes, s, *, tb=None, tc=None):
    """s * (normalize(x) @ normalize(W).T) using pre-normalized wn_t:(F_pad, C_pad).
    Returns f32 (B, n_classes); class padding never leaves this function."""
    B, F = x.shape
    F_pad, C_pad = wn_t.shape
    if F != F_pad:
        # Zero feature padding changes neither ||x|| nor the dot product.
        x = jnp.pad(x, ((0, 0), (0, F_pad - F)))
    C_kern = _round_up(n_classes, _FEAT_ALIGN)              # lane-dense kernel output width

    x_bytes = x.dtype.itemsize
    w_bytes = wn_t.dtype.itemsize
    budget, limit, tb_cap, n_tc = _hw_config()

    if tc is None:
        tc = min(_CLASS_ALIGN, C_kern)
    if tb is None:
        tb = B if B <= tb_cap else tb_cap
        if n_tc > 1 and tb >= B and B >= 512:
            # Keep >=2 batch blocks so the "parallel" axis spans both v7x TensorCores.
            tb = _round_up((B + 1) // 2, 256)

    def footprint(tb_, tc_):
        io = 2 * (tb_ * F_pad * x_bytes + F_pad * tc_ * w_bytes + tb_ * tc_ * 4)
        # In-kernel temporaries: f32 copy of x, xn scratch, f32 matmul result.
        temps = tb_ * F_pad * (4 + w_bytes) + tb_ * tc_ * 4
        return io + temps

    # Shrink the class tile first (arithmetic intensity ~ tb); keep MXU-friendly
    # >=256 tiles unless VMEM truly forces smaller.
    while footprint(tb, tc) > budget and tc > 256:
        tc = max(256, tc // 2)
    while footprint(tb, tc) > budget and tb > 256:
        tb = max(256, ((tb // 2) // 256) * 256)
    while footprint(tb, tc) > budget and tc > 128:
        tc = 128
    while footprint(tb, tc) > budget and tb > 8:
        tb = max(8, ((tb // 2) // 8) * 8)

    grid = (pl.cdiv(B, tb), pl.cdiv(C_kern, tc))
    assert grid[1] * tc <= C_pad, "class padding must cover the scheduled class tiles"

    # Advisory cost: count the re-streaming of wn_t across batch tiles as scheduled.
    cost = pl.CostEstimate(
        flops=2 * grid[0] * grid[1] * tb * tc * F_pad,
        transcendentals=grid[0] * tb,
        bytes_accessed=(grid[0] * tb * F_pad * x_bytes
                        + grid[0] * grid[1] * F_pad * tc * w_bytes
                        + grid[0] * grid[1] * tb * tc * 4),
    )

    s_arr = jnp.asarray(s, dtype=jnp.float32).reshape((1,))
    out = pl.pallas_call(
        _scaled_cosine_kernel,
        out_shape=jax.ShapeDtypeStruct((B, C_kern), jnp.float32),
        grid_spec=pltpu.PrefetchScalarGridSpec(
            num_scalar_prefetch=1,
            grid=grid,
            in_specs=[
                pl.BlockSpec((tb, F_pad), lambda i, j, s_ref: (i, 0)),
                pl.BlockSpec((F_pad, tc), lambda i, j, s_ref: (0, j)),
            ],
            out_specs=pl.BlockSpec((tb, tc), lambda i, j, s_ref: (i, j)),
            scratch_shapes=[pltpu.VMEM((tb, F_pad), wn_t.dtype)],
        ),
        compiler_params=pltpu.CompilerParams(
            # Class axis is sequential: the x tile / xn scratch is resident across it.
            # Batch axis is the megacore-parallel axis.
            dimension_semantics=("parallel", "arbitrary"),
            vmem_limit_bytes=limit,
        ),
        cost_estimate=cost,
    )(s_arr, x, wn_t)

    if C_kern != n_classes:
        # Only when C % 128 != 0; padded columns are exactly 0 and XLA fuses this
        # slice into downstream consumers.
        out = out[:, :n_classes]
    return out


# ---------------------------------------------------------------------------
# Adaptive-s statistic (PyTorch does this under torch.no_grad()).  Functional:
# takes the already-scaled logits (s * cos) from the fused kernel and returns
# (output, new_s) so no traced value has to be stashed in Python state.
# Avoids the (B, C) one_hot / masked-exp materialization:
#   B_avg = (sum(exp(s*cos)) - sum(exp(s*cos_target))) / B
# and theta is computed only at the B target entries (lower median, like torch).
# ---------------------------------------------------------------------------
def adacos_train_update(scaled_logits, label, s, n_classes):
    B = scaled_logits.shape[0]
    label = label.astype(jnp.int32)
    sl = jax.lax.stop_gradient(scaled_logits)
    target_sl = sl[jnp.arange(B), label]                    # (B,) = s * cos(theta_target)
    B_avg = (jnp.sum(jnp.exp(sl)) - jnp.sum(jnp.exp(target_sl))) / B
    theta_t = jnp.arccos(jnp.clip(target_sl / s, -1.0 + 1e-07, 1.0 - 1e-07))
    theta_med = jnp.sort(theta_t)[(B - 1) // 2]             # torch.median -> lower median
    new_s = jnp.log(B_avg) / jnp.cos(jnp.minimum(jnp.pi / 4.0, theta_med))
    output = (new_s / s) * scaled_logits                    # == new_s * cos  (PyTorch: new s)
    return output, new_s


class AdaCosJax:
    """JAX/Pallas equivalent of the PyTorch AdaCos module (forward pass)."""

    def __init__(self, num_features, num_classes, m: float = 0.5, *, key=None,
                 matmul_dtype=jnp.bfloat16):
        self.num_features = num_features
        self.n_classes = num_classes
        self.s = math.sqrt(2.0) * math.log(num_classes - 1)
        self.m = m
        self.matmul_dtype = matmul_dtype        # use jnp.float32 for strict f32 parity
        if key is None:
            key = jax.random.PRNGKey(0)
        # xavier_uniform_: bound = sqrt(6/(fan_in+fan_out)), fan_in=F, fan_out=C
        bound = math.sqrt(6.0 / (num_features + num_classes))
        self.W = jax.random.uniform(
            key, (num_classes, num_features), dtype=jnp.float32,
            minval=-bound, maxval=bound,
        )
        # One-time: pad + normalize + transpose; recompute whenever W changes.
        self.Wn_t = prepare_normalized_weight(self.W, matmul_dtype)
        self.training = False

    def __call__(self, x, label=None):
        if label is None:
            # raw cosine logits (s = 1 fused in-kernel)
            return scaled_cosine_logits(x, self.Wn_t, self.n_classes, 1.0)
        s = jnp.asarray(self.s, dtype=jnp.float32)
        scaled = scaled_cosine_logits(x, self.Wn_t, self.n_classes, s)   # s * cos
        if self.training:
            output, new_s = adacos_train_update(scaled, label, s, self.n_classes)
            # Eager-only convenience; under jax.jit keep s in an explicit state pytree
            # and call adacos_train_update directly (otherwise a tracer leaks here).
            # TODO(synk): expose a purely functional train-step API for jitted users.
            self.s = new_s
            return output
        return scaled


if __name__ == "__main__":
    key = jax.random.PRNGKey(0)
    k_w, k_x, k_l = jax.random.split(key, 3)

    num_features, num_classes, batch = 32, 16, 8
    model = AdaCosJax(num_features, num_classes, key=k_w)

    x = jax.random.normal(k_x, (batch, num_features), dtype=jnp.float32)
    label = jax.random.randint(k_l, (batch,), 0, num_classes, dtype=jnp.int32)

    # label=None path: raw cosine logits
    logits = jax.block_until_ready(model(x))
    # eval path with label: s * cosine
    out = jax.block_until_ready(model(x, label))
    # training path (adaptive s), eager
    model.training = True
    out_tr = jax.block_until_ready(model(x, label))

    assert logits.shape == (batch, num_classes)
    assert out.shape == (batch, num_classes)
    assert out_tr.shape == (batch, num_classes)

    # Pure-JAX f32 reference; loose tolerance for the bf16 MXU path.
    xn = x / jnp.maximum(jnp.linalg.norm(x, axis=-1, keepdims=True), 1e-12)
    Wn = model.W / jnp.maximum(jnp.linalg.norm(model.W, axis=-1, keepdims=True), 1e-12)
    ref_cos = xn @ Wn.T
    max_err = float(jnp.max(jnp.abs(logits - ref_cos)))
    assert max_err < 5e-2, f"cosine mismatch: {max_err}"
    assert bool(jnp.all(jnp.isfinite(out_tr)))

    print("KERNEL_OK")
</pallas_src>

<mosaic_0001>
module attributes {stable_mosaic.version = 11 : i64} {
  func.func @_l2_normalize_rows_kernel(%arg0: i32, %arg1: memref<512x128xf32, #tpu.memory_space<vmem>>, %arg2: memref<512x128xbf16, #tpu.memory_space<vmem>>) attributes {dimension_semantics = [#tpu.dimension_semantics<parallel>], iteration_bounds = array<i64: 1>, scalar_prefetch = 0 : i64, scratch_operands = 0 : i64, tpu.core_type = #tpu.core_type<tc>, window_params = [{transform_indices = @transform_0, window_bounds = array<i64: 512, 128>}, {transform_indices = @transform_1, window_bounds = array<i64: 512, 128>}]} {
    %c0 = arith.constant 0 : index
    %c0_0 = arith.constant 0 : index
    %0 = vector.load %arg1[%c0, %c0_0] : memref<512x128xf32, #tpu.memory_space<vmem>>, vector<512x128xf32>
    %1 = arith.mulf %0, %0 : vector<512x128xf32>
    %cst = arith.constant dense<0.000000e+00> : vector<512xf32>
    %2 = vector.multi_reduction <add>, %1, %cst [1] : vector<512x128xf32> to vector<512xf32>
    %3 = vector.shape_cast %2 : vector<512xf32> to vector<512x1xf32>
    %cst_1 = arith.constant 1.000000e-24 : f32
    %4 = vector.broadcast %cst_1 : f32 to vector<512x1xf32>
    %5 = arith.maximumf %3, %4 : vector<512x1xf32>
    %6 = math.rsqrt %5 : vector<512x1xf32>
    %7 = vector.broadcast %6 : vector<512x1xf32> to vector<512x128xf32>
    %8 = arith.mulf %0, %7 : vector<512x128xf32>
    %9 = arith.truncf %8 : vector<512x128xf32> to vector<512x128xbf16>
    %c0_2 = arith.constant 0 : index
    %c0_3 = arith.constant 0 : index
    %10 = vector.load %arg2[%c0_2, %c0_3] : memref<512x128xbf16, #tpu.memory_space<vmem>>, vector<512x128xbf16>
    tpu.vector_store %arg2[%c0_2, %c0_3], %9 {strides = array<i32>} : memref<512x128xbf16, #tpu.memory_space<vmem>>, vector<512x128xbf16>,
    return
  }
  func.func @transform_0(%arg0: i32) -> (i32, i32) {
    %c0_i32 = arith.constant 0 : i32
    %c0_i32_0 = arith.constant 0 : i32
    return %arg0, %c0_i32 : i32, i32
  }
  func.func @transform_1(%arg0: i32) -> (i32, i32) {
    %c0_i32 = arith.constant 0 : i32
    %c0_i32_0 = arith.constant 0 : i32
    return %arg0, %c0_i32 : i32, i32
  }
}

</mosaic_0001>

<bundles_post_ra>
// kernel: tpu_custom_call.1
= control target key start
LH: loop header
LB: loop body
LE: loop exit
PB: predicated region body
PF: predicated region fallthrough
CT: control target
= control target key end

     0   :  { %6 = vsyncpa [#allocation3], 0  ;;  %s1669_s0 = inlined_call_operand.hbm [shape: f32[512,128], index: 0, kind: input, shape index: {}]   ;;  %s1670_s1 = inlined_call_operand.hbm [shape: bf16[512,128], index: 1, kind: output, shape index: {}]  }
   0x1   :  { %7 = vsyncpa [#allocation4], 0  ;;  %s1309_s6 = smov [#allocation2]   ;;  %s1261_s10 = scalar_lea.hbm %s1669_s0, 8192 }
   0x2   :  { %s13_s7 = sshll.u32 %s1309_s6, 4  ;;  %p1262_p0 = scmp.ne.s32.totalorder %s1669_s0, %s1261_s10  ;;  %s14_s7 = int_to_ptr.vmem [resolvable:$true] %s13_s7 }
   0x3   :  { %p1265_p1 = scmp.lt.u32.totalorder %s1261_s10, %s1669_s0 }
   0x5   :  { %p1267_p2 = pnand %p1265_p1, %p1262_p0 }
   0x7   :  { %1270 = shalt.err (!%p1267_p2)
}
   0x8   :  { %s1271_s15 = scalar_lea.vmem %s14_s7, 8192  ;;  %p1276_p4 = scmp.lt.s32.totalorder %s14_s7, %s14_s7 }
   0x9   :  { %p1272_p3 = scmp.ne.s32.totalorder %s14_s7, %s1271_s15  ;;  %p1277_p5 = scmp.lt.s32.totalorder %s1271_s15, %s1271_s15 }
   0xb   :  { %p1278_p6 = por %p1277_p5, %p1276_p4 }
   0xd   :  { %p1279_p7 = pnand %p1278_p6, %p1272_p3 }
   0xf   :  { %1282 = shalt.err (!%p1279_p7)
}
  0x10   :  { %s1310_s16 = smov 128   ;;  %s1311_s17 = smov 8  }
  0x11   :  { %19 = dma.hbm_to_vmem [thread:$0]  %s1669_s0, 8192, %s14_s7, [#allocation3], %s1310_s16, %s1310_s16, %s1311_s17  }
  0x12   :  { %1305 = dma.done.wait [#allocation3], 8192  }
  0x13   :  { %1306 = vsyncadd [#allocation3], 4294959104  ;;  %v1337_v0 = vld [vmem:[#allocation2 + $0x10] sm:$0xff]  ;;  %v1339_v1 = vld [vmem:[#allocation2] sm:$0xff]  ;;  %s1312_s0 = smov [#allocation5]  }
  0x14   :  { %v1341_v2 = vld [vmem:[#allocation2 + $0x18] sm:$0xff]  ;;  %v89_v3 = vmul.f32 %v1337_v0, %v1337_v0  ;;  %v87_v4 = vmul.f32 %v1339_v1, %v1339_v1  ;;  %v1347_v5 = vld [vmem:[#allocation2 + $0x8] sm:$0xff]  ;;  %v1355_v9 = vld [vmem:[#allocation2 + $0x20] sm:$0xff]  ;;  %s796_s20 = sshll.u32 %s1312_s0, 4  ;;  %s797_s20 = int_to_ptr.vmem [resolvable:$true] %s796_s20 }
  0x15   :  { %v90_v6 = vmul.f32 %v1341_v2, %v1341_v2  ;;  %v88_v7 = vmul.f32 %v1347_v5, %v1347_v5  ;;  %v1353_v8 = vld [vmem:[#allocation2 + $0x28] sm:$0xff]  ;;  %v91_v11 = vmul.f32 %v1355_v9, %v1355_v9  ;;  %v1361_v12 = vld [vmem:[#allocation2 + $0x38] sm:$0xff]  ;;  %v1363_v13 = vld [vmem:[#allocation2 + $0x30] sm:$0xff]  ;;  %s1283_s21 = scalar_lea.vmem %s797_s20, 4096  ;;  %p1288_p9 = scmp.lt.s32.totalorder %s797_s20, %s797_s20 }
  0x16   :  { %155 = vadd.xlane.f32.xlu1 %v89_v3  ;;  %151 = vadd.xlane.f32.xlu0 %v87_v4  ;;  %v92_v10 = vmul.f32 %v1353_v8, %v1353_v8  ;;  %v94_v14 = vmul.f32 %v1361_v12, %v1361_v12  ;;  %v93_v15 = vmul.f32 %v1363_v13, %v1363_v13  ;;  %v1369_v16 = vld [vmem:[#allocation2 + $0x48] sm:$0xff]  ;;  %v1371_v17 = vld [vmem:[#allocation2 + $0x40] sm:$0xff]  ;;  %v1377_v20 = vld [vmem:[#allocation2 + $0x58] sm:$0xff]  ;;  %p1284_p8 = scmp.ne.s32.totalorder %s797_s20, %s1283_s21  ;;  %p1289_p10 = scmp.lt.s32.totalorder %s1283_s21, %s1283_s21 }
  0x17   :  { %v96_v18 = vmul.f32 %v1369_v16, %v1369_v16  ;;  %v95_v19 = vmul.f32 %v1371_v17, %v1371_v17  ;;  %v1379_v21 = vld [vmem:[#allocation2 + $0x50] sm:$0xff]  ;;  %v98_v22 = vmul.f32 %v1377_v20, %v1377_v20  ;;  %v1385_v24 = vld [vmem:[#allocation2 + $0x68] sm:$0xff]  ;;  %v1387_v25 = vld [vmem:[#allocation2 + $0x60] sm:$0xff] }
  0x18   :  { %v97_v23 = vmul.f32 %v1379_v21, %v1379_v21  ;;  %v100_v26 = vmul.f32 %v1385_v24, %v1385_v24  ;;  %v99_v27 = vmul.f32 %v1387_v25, %v1387_v25  ;;  %v1393_v28 = vld [vmem:[#allocation2 + $0x78] sm:$0xff]  ;;  %v1395_v29 = vld [vmem:[#allocation2 + $0x70] sm:$0xff]  ;;  %v1401_v32 = vld [vmem:[#allocation2 + $0x88] sm:$0xff]  ;;  %p1290_p11 = por %p1289_p10, %p1288_p9 }
  0x19   :  { %v102_v30 = vmul.f32 %v1393_v28, %v1393_v28  ;;  %v101_v31 = vmul.f32 %v1395_v29, %v1395_v29  ;;  %v1403_v33 = vld [vmem:[#allocation2 + $0x80] sm:$0xff]  ;;  %v104_v34 = vmul.f32 %v1401_v32, %v1401_v32  ;;  %v1409_v36 = vld [vmem:[#allocation2 + $0x98] sm:$0xff]  ;;  %v1411_v37 = vld [vmem:[#allocation2 + $0x90] sm:$0xff] }
  0x1a   :  { %157 = vadd.xlane.f32.xlu1 %v90_v6  ;;  %153 = vadd.xlane.f32.xlu0 %v88_v7  ;;  %v103_v35 = vmul.f32 %v1403_v33, %v1403_v33  ;;  %v106_v38 = vmul.f32 %v1409_v36, %v1409_v36  ;;  %v105_v39 = vmul.f32 %v1411_v37, %v1411_v37  ;;  %v1417_v40 = vld [vmem:[#allocation2 + $0xa8] sm:$0xff]  ;;  %v1419_v41 = vld [vmem:[#allocation2 + $0xa0] sm:$0xff]  ;;  %v1425_v44 = vld [vmem:[#allocation2 + $0xb8] sm:$0xff]  ;;  %p1291_p12 = pnand %p1290_p11, %p1284_p8 }
  0x1b   :  { %v108_v42 = vmul.f32 %v1417_v40, %v1417_v40  ;;  %v107_v43 = vmul.f32 %v1419_v41, %v1419_v41  ;;  %v1427_v45 = vld [vmem:[#allocation2 + $0xb0] sm:$0xff]  ;;  %v110_v46 = vmul.f32 %v1425_v44, %v1425_v44  ;;  %v1433_v48 = vld [vmem:[#allocation2 + $0xc8] sm:$0xff]  ;;  %v1435_v49 = vld [vmem:[#allocation2 + $0xc0] sm:$0xff] }
  0x1c   :  { %v109_v47 = vmul.f32 %v1427_v45, %v1427_v45  ;;  %v112_v50 = vmul.f32 %v1433_v48, %v1433_v48  ;;  %v111_v51 = vmul.f32 %v1435_v49, %v1435_v49  ;;  %v1441_v52 = vld [vmem:[#allocation2 + $0xd8] sm:$0xff]  ;;  %v1443_v53 = vld [vmem:[#allocation2 + $0xd0] sm:$0xff]  ;;  %v1449_v56 = vld [vmem:[#allocation2 + $0xe8] sm:$0xff] }
  0x1d   :  { %v114_v54 = vmul.f32 %v1441_v52, %v1441_v52  ;;  %v113_v55 = vmul.f32 %v1443_v53, %v1443_v53  ;;  %v1451_v57 = vld [vmem:[#allocation2 + $0xe0] sm:$0xff]  ;;  %v116_v58 = vmul.f32 %v1449_v56, %v1449_v56  ;;  %v1457_v60 = vld [vmem:[#allocation2 + $0xf8] sm:$0xff]  ;;  %v1459_v61 = vld [vmem:[#allocation2 + $0xf0] sm:$0xff] }
  0x1e   :  { %161 = vadd.xlane.f32.xlu1 %v92_v10  ;;  %159 = vadd.xlane.f32.xlu0 %v91_v11  ;;  %v115_v59 = vmul.f32 %v1451_v57, %v1451_v57  ;;  %v118_v62 = vmul.f32 %v1457_v60, %v1457_v60  ;;  %v117_v63 = vmul.f32 %v1459_v61, %v1459_v61  ;;  %v1465_v3 = vld [vmem:[#allocation2 + $0x108] sm:$0xff]  ;;  %v1467_v4 = vld [vmem:[#allocation2 + $0x100] sm:$0xff]  ;;  %v1473_v10 = vld [vmem:[#allocation2 + $0x118] sm:$0xff] }
  0x1f   :  { %v120_v6 = vmul.f32 %v1465_v3, %v1465_v3  ;;  %v119_v7 = vmul.f32 %v1467_v4, %v1467_v4  ;;  %v1475_v11 = vld [vmem:[#allocation2 + $0x110] sm:$0xff] }
  0x22   :  { %165 = vadd.xlane.f32.xlu1 %v94_v14  ;;  %163 = vadd.xlane.f32.xlu0 %v93_v15  ;;  %v122_v14 = vmul.f32 %v1473_v10, %v1473_v10  ;;  %v121_v15 = vmul.f32 %v1475_v11, %v1475_v11 }
  0x26   :  { %169 = vadd.xlane.f32.xlu1 %v96_v18  ;;  %167 = vadd.xlane.f32.xlu0 %v95_v19  ;;  %v1481_v18 = vld [vmem:[#allocation2 + $0x128] sm:$0xff]  ;;  %v1483_v19 = vld [vmem:[#allocation2 + $0x120] sm:$0xff] }
  0x2a   :  { %173 = vadd.xlane.f32.xlu1 %v98_v22  ;;  %171 = vadd.xlane.f32.xlu0 %v97_v23  ;;  %v124_v22 = vmul.f32 %v1481_v18, %v1481_v18  ;;  %v123_v23 = vmul.f32 %v1483_v19, %v1483_v19 }
  0x2e   :  { %177 = vadd.xlane.f32.xlu1 %v100_v26  ;;  %175 = vadd.xlane.f32.xlu0 %v99_v27  ;;  %v1489_v26 = vld [vmem:[#allocation2 + $0x138] sm:$0xff]  ;;  %v1491_v27 = vld [vmem:[#allocation2 + $0x130] sm:$0xff] }
  0x32   :  { %181 = vadd.xlane.f32.xlu1 %v102_v30  ;;  %179 = vadd.xlane.f32.xlu0 %v101_v31  ;;  %v126_v30 = vmul.f32 %v1489_v26, %v1489_v26  ;;  %v125_v31 = vmul.f32 %v1491_v27, %v1491_v27 }
  0x36   :  { %185 = vadd.xlane.f32.xlu1 %v104_v34  ;;  %183 = vadd.xlane.f32.xlu0 %v103_v35  ;;  %v1497_v34 = vld [vmem:[#allocation2 + $0x148] sm:$0xff]  ;;  %v1499_v35 = vld [vmem:[#allocation2 + $0x140] sm:$0xff] }
  0x3a   :  { %189 = vadd.xlane.f32.xlu1 %v106_v38  ;;  %187 = vadd.xlane.f32.xlu0 %v105_v39  ;;  %v128_v38 = vmul.f32 %v1497_v34, %v1497_v34  ;;  %v127_v39 = vmul.f32 %v1499_v35, %v1499_v35 }
  0x3e   :  { %193 = vadd.xlane.f32.xlu1 %v108_v42  ;;  %191 = vadd.xlane.f32.xlu0 %v107_v43  ;;  %v1505_v42 = vld [vmem:[#allocation2 + $0x158] sm:$0xff]  ;;  %v1507_v43 = vld [vmem:[#allocation2 + $0x150] sm:$0xff] }
  0x42   :  { %197 = vadd.xlane.f32.xlu1 %v110_v46  ;;  %195 = vadd.xlane.f32.xlu0 %v109_v47  ;;  %v130_v46 = vmul.f32 %v1505_v42, %v1505_v42  ;;  %v129_v47 = vmul.f32 %v1507_v43, %v1507_v43 }
  0x46   :  { %201 = vadd.xlane.f32.xlu1 %v112_v50  ;;  %199 = vadd.xlane.f32.xlu0 %v111_v51  ;;  %v1513_v50 = vld [vmem:[#allocation2 + $0x168] sm:$0xff]  ;;  %v1515_v51 = vld [vmem:[#allocation2 + $0x160] sm:$0xff] }
  0x47   :  { %1690 = vst [vmem:[#allocation8_spill] sm:$0xff] %v1515_v51 }
  0x4a   :  { %205 = vadd.xlane.f32.xlu1 %v114_v54  ;;  %203 = vadd.xlane.f32.xlu0 %v113_v55  ;;  %v132_v54 = vmul.f32 %v1513_v50, %v1513_v50  ;;  %v131_v55 = vmul.f32 %v1515_v51, %v1515_v51 }
  0x4e   :  { %209 = vadd.xlane.f32.xlu1 %v116_v58  ;;  %207 = vadd.xlane.f32.xlu0 %v115_v59  ;;  %v1521_v58 = vld [vmem:[#allocation2 + $0x178] sm:$0xff]  ;;  %v1523_v59 = vld [vmem:[#allocation2 + $0x170] sm:$0xff] }
  0x4f   :  { %1691 = vst [vmem:[#allocation9_spill] sm:$0xff] %v1521_v58  ;;  %1692 = vst [vmem:[#allocation10_spill] sm:$0xff] %v1523_v59 }
  0x52   :  { %213 = vadd.xlane.f32.xlu1 %v118_v62  ;;  %211 = vadd.xlane.f32.xlu0 %v117_v63  ;;  %v134_v62 = vmul.f32 %v1521_v58, %v1521_v58  ;;  %v133_v63 = vmul.f32 %v1523_v59, %v1523_v59 }
  0x56   :  { %217 = vadd.xlane.f32.xlu1 %v120_v6  ;;  %215 = vadd.xlane.f32.xlu0 %v119_v7  ;;  %v1529_v6 = vld [vmem:[#allocation2 + $0x188] sm:$0xff]  ;;  %v1531_v7 = vld [vmem:[#allocation2 + $0x180] sm:$0xff] }
  0x57   :  { %1693 = vst [vmem:[#allocation11_spill] sm:$0xff] %v1529_v6  ;;  %1694 = vst [vmem:[#allocation12_spill] sm:$0xff] %v1531_v7 }
  0x5a   :  { %221 = vadd.xlane.f32.xlu1 %v122_v14  ;;  %219 = vadd.xlane.f32.xlu0 %v121_v15  ;;  %v136_v14 = vmul.f32 %v1529_v6, %v1529_v6  ;;  %v135_v15 = vmul.f32 %v1531_v7, %v1531_v7 }
  0x5e   :  { %225 = vadd.xlane.f32.xlu1 %v124_v22  ;;  %223 = vadd.xlane.f32.xlu0 %v123_v23  ;;  %v1537_v22 = vld [vmem:[#allocation2 + $0x198] sm:$0xff]  ;;  %v1539_v23 = vld [vmem:[#allocation2 + $0x190] sm:$0xff] }
  0x5f   :  { %1695 = vst [vmem:[#allocation13_spill] sm:$0xff] %v1537_v22  ;;  %1696 = vst [vmem:[#allocation14_spill] sm:$0xff] %v1539_v23 }
  0x62   :  { %229 = vadd.xlane.f32.xlu1 %v126_v30  ;;  %227 = vadd.xlane.f32.xlu0 %v125_v31  ;;  %v138_v30 = vmul.f32 %v1537_v22, %v1537_v22  ;;  %v137_v31 = vmul.f32 %v1539_v23, %v1539_v23 }
  0x66   :  { %233 = vadd.xlane.f32.xlu1 %v128_v38  ;;  %231 = vadd.xlane.f32.xlu0 %v127_v39  ;;  %v1545_v38 = vld [vmem:[#allocation2 + $0x1a8] sm:$0xff]  ;;  %v1547_v39 = vld [vmem:[#allocation2 + $0x1a0] sm:$0xff] }
  0x67   :  { %1697 = vst [vmem:[#allocation15_spill] sm:$0xff] %v1545_v38  ;;  %1698 = vst [vmem:[#allocation16_spill] sm:$0xff] %v1547_v39 }
  0x6a   :  { %237 = vadd.xlane.f32.xlu1 %v130_v46  ;;  %235 = vadd.xlane.f32.xlu0 %v129_v47  ;;  %v140_v46 = vmul.f32 %v1545_v38, %v1545_v38  ;;  %v139_v47 = vmul.f32 %v1547_v39, %v1547_v39 }
  0x6e   :  { %241 = vadd.xlane.f32.xlu1 %v132_v54  ;;  %239 = vadd.xlane.f32.xlu0 %v131_v55  ;;  %v1553_v54 = vld [vmem:[#allocation2 + $0x1b8] sm:$0xff]  ;;  %v1555_v55 = vld [vmem:[#allocation2 + $0x1b0] sm:$0xff] }
  0x6f   :  { %1699 = vst [vmem:[#allocation17_spill] sm:$0xff] %v1553_v54  ;;  %1700 = vst [vmem:[#allocation18_spill] sm:$0xff] %v1555_v55 }
  0x72   :  { %245 = vadd.xlane.f32.xlu1 %v134_v62  ;;  %243 = vadd.xlane.f32.xlu0 %v133_v63  ;;  %v142_v62 = vmul.f32 %v1553_v54, %v1553_v54  ;;  %v141_v63 = vmul.f32 %v1555_v55, %v1555_v55 }
  0x76   :  { %249 = vadd.xlane.f32.xlu1 %v136_v14  ;;  %247 = vadd.xlane.f32.xlu0 %v135_v15  ;;  %v1561_v14 = vld [vmem:[#allocation2 + $0x1c8] sm:$0xff]  ;;  %v1563_v15 = vld [vmem:[#allocation2 + $0x1c0] sm:$0xff] }
  0x77   :  { %1701 = vst [vmem:[#allocation19_spill] sm:$0xff] %v1561_v14  ;;  %1702 = vst [vmem:[#allocation20_spill] sm:$0xff] %v1563_v15 }
  0x7a   :  { %253 = vadd.xlane.f32.xlu1 %v138_v30  ;;  %251 = vadd.xlane.f32.xlu0 %v137_v31  ;;  %v144_v30 = vmul.f32 %v1561_v14, %v1561_v14  ;;  %v143_v31 = vmul.f32 %v1563_v15, %v1563_v15 }
  0x7e   :  { %257 = vadd.xlane.f32.xlu1 %v140_v46  ;;  %255 = vadd.xlane.f32.xlu0 %v139_v47  ;;  %v1569_v46 = vld [vmem:[#allocation2 + $0x1d8] sm:$0xff]  ;;  %v1571_v47 = vld [vmem:[#allocation2 + $0x1d0] sm:$0xff] }
  0x7f   :  { %1703 = vst [vmem:[#allocation21_spill] sm:$0xff] %v1569_v46  ;;  %1704 = vst [vmem:[#allocation22_spill] sm:$0xff] %v1571_v47  ;;  %v146_v55 = vmul.f32 %v1569_v46, %v1569_v46  ;;  %v145_v54 = vmul.f32 %v1571_v47, %v1571_v47 }
  0x82   :  { %261 = vadd.xlane.f32.xlu1 %v142_v62  ;;  %259 = vadd.xlane.f32.xlu0 %v141_v63  ;;  %v1577_v62 = vld [vmem:[#allocation2 + $0x1e8] sm:$0xff]  ;;  %v1579_v63 = vld [vmem:[#allocation2 + $0x1e0] sm:$0xff] }
  0x83   :  { %1705 = vst [vmem:[#allocation23_spill] sm:$0xff] %v1577_v62  ;;  %1706 = vst [vmem:[#allocation24_spill] sm:$0xff] %v1579_v63  ;;  %v148_v15 = vmul.f32 %v1577_v62, %v1577_v62  ;;  %v147_v14 = vmul.f32 %v1579_v63, %v1579_v63 }
  0x86   :  { %265 = vadd.xlane.f32.xlu1 %v144_v30  ;;  %263 = vadd.xlane.f32.xlu0 %v143_v31  ;;  %v1585_v30 = vld [vmem:[#allocation2 + $0x1f8] sm:$0xff]  ;;  %v1587_v31 = vld [vmem:[#allocation2 + $0x1f0] sm:$0xff] }
  0x87   :  { %1707 = vst [vmem:[#allocation25_spill] sm:$0xff] %v1585_v30  ;;  %1708 = vst [vmem:[#allocation26_spill] sm:$0xff] %v1587_v31  ;;  %v150_v47 = vmul.f32 %v1585_v30, %v1585_v30  ;;  %v149_v46 = vmul.f32 %v1587_v31, %v1587_v31 }
  0x8a   :  { %269 = vadd.xlane.f32.xlu1 %v146_v55  ;;  %267 = vadd.xlane.f32.xlu0 %v145_v54 }
  0x8e   :  { %273 = vadd.xlane.f32.xlu1 %v148_v15  ;;  %271 = vadd.xlane.f32.xlu0 %v147_v14 }
  0x92   :  { %277 = vadd.xlane.f32.xlu1 %v150_v47  ;;  %275 = vadd.xlane.f32.xlu0 %v149_v46 }
  0xa3   :  { %v156_v54 = vpop.xlane.xlu1 %155  ;;  %v152_v55 = vpop.xlane.xlu0 %151 }
  0xa4   :  { %v281_v62 = vmax.f32 %v156_v54, 1e-24  ;;  %v279_v39 = vmax.f32 %v152_v55, 1e-24 }
  0xa6   :  { %1133 = vrsqrt.f32 %v281_v62 }
  0xa7   :  { %v158_v38 = vpop.xlane.xlu1 %157  ;;  %v154_v63 = vpop.xlane.xlu0 %153  ;;  %1135 = vrsqrt.f32 %v279_v39 }
  0xa8   :  { %v282_v23 = vmax.f32 %v158_v38, 1e-24  ;;  %v280_v22 = vmax.f32 %v154_v63, 1e-24 }
  0xaa   :  { %1137 = vrsqrt.f32 %v282_v23 }
  0xab   :  { %1139 = vrsqrt.f32 %v280_v22  ;;  %v162_v14 = vpop.xlane.xlu1 %161  ;;  %v160_v15 = vpop.xlane.xlu0 %159 }
  0xac   :  { %v284_v30 = vmax.f32 %v162_v14, 1e-24  ;;  %v283_v7 = vmax.f32 %v160_v15, 1e-24 }
  0xae   :  { %1141 = vrsqrt.f32 %v284_v30 }
  0xaf   :  { %1143 = vrsqrt.f32 %v283_v7  ;;  %v166_v47 = vpop.xlane.xlu1 %165  ;;  %v164_v46 = vpop.xlane.xlu0 %163 }
  0xb0   :  { %v286_v31 = vmax.f32 %v166_v47, 1e-24  ;;  %v285_v6 = vmax.f32 %v164_v46, 1e-24  ;;  %v1134_v54 = vpop.eup %1133 }
  0xb1   :  { %v1136_v55 = vpop.eup %1135  ;;  %v409_v59 = vmul.f32 %v1134_v54, %v1337_v0 }
  0xb2   :  { %1145 = vrsqrt.f32 %v286_v31  ;;  %v407_v7 = vmul.f32 %v1136_v55, %v1339_v1 }
  0xb3   :  { %1147 = vrsqrt.f32 %v285_v6  ;;  %v170_v62 = vpop.xlane.xlu1 %169  ;;  %v168_v38 = vpop.xlane.xlu0 %167 }
  0xb4   :  { %v1138_v63 = vpop.eup %1137  ;;  %v288_v39 = vmax.f32 %v170_v62, 1e-24  ;;  %v287_v23 = vmax.f32 %v168_v38, 1e-24 }
  0xb5   :  { %v1140_v22 = vpop.eup %1139  ;;  %v410_v14 = vmul.f32 %v1138_v63, %v1341_v2 }
  0xb6   :  { %v408_v30 = vmul.f32 %v1140_v22, %v1347_v5  ;;  %1149 = vrsqrt.f32 %v288_v39 }
  0xb7   :  { %v944_v15 = vpack.c.bf16 %v410_v14, %v409_v59  ;;  %1151 = vrsqrt.f32 %v287_v23  ;;  %v174_v31 = vpop.xlane.xlu1 %173  ;;  %v172_v47 = vpop.xlane.xlu0 %171 }
  0xb8   :  { %v1142_v6 = vpop.eup %1141  ;;  %v939_v46 = vpack.c.bf16 %v408_v30, %v407_v7  ;;  %v290_v58 = vmax.f32 %v174_v31, 1e-24  ;;  %v289_v51 = vmax.f32 %v172_v47, 1e-24 }
  0xb9   :  { %v1144_v62 = vpop.eup %1143  ;;  %1096 = vst [vmem:[#allocation5 + $0x8] sm:$0xff] %v944_v15   ;;  %v412_v38 = vmul.f32 %v1142_v6, %v1353_v8 }
  0xba   :  { %940 = vst [vmem:[#allocation5] sm:$0xff] %v939_v46   ;;  %v411_v0 = vmul.f32 %v1144_v62, %v1355_v9  ;;  %1153 = vrsqrt.f32 %v290_v58 }
  0xbb   :  { %1155 = vrsqrt.f32 %v289_v51  ;;  %v178_v1 = vpop.xlane.xlu1 %177  ;;  %v176_v2 = vpop.xlane.xlu0 %175 }
  0xbc   :  { %v1146_v5 = vpop.eup %1145  ;;  %v949_v59 = vpack.c.bf16 %v412_v38, %v411_v0  ;;  %v292_v54 = vmax.f32 %v178_v1, 1e-24  ;;  %v291_v55 = vmax.f32 %v176_v2, 1e-24 }
  0xbd   :  { %v1148_v63 = vpop.eup %1147  ;;  %v414_v39 = vmul.f32 %v1146_v5, %v1361_v12 }
  0xbe   :  { %1097 = vst [vmem:[#allocation5 + $0x10] sm:$0xff] %v949_v59   ;;  %v413_v23 = vmul.f32 %v1148_v63, %v1363_v13  ;;  %1157 = vrsqrt.f32 %v292_v54 }
  0xbf   :  { %1159 = vrsqrt.f32 %v291_v55  ;;  %v182_v8 = vpop.xlane.xlu1 %181  ;;  %v180_v22 = vpop.xlane.xlu0 %179 }
  0xc0   :  { %v1150_v14 = vpop.eup %1149  ;;  %v954_v9 = vpack.c.bf16 %v414_v39, %v413_v23  ;;  %v294_v58 = vmax.f32 %v182_v8, 1e-24  ;;  %v293_v51 = vmax.f32 %v180_v22, 1e-24 }
  0xc1   :  { %v1152_v7 = vpop.eup %1151  ;;  %v416_v30 = vmul.f32 %v1150_v14, %v1369_v16 }
  0xc2   :  { %1098 = vst [vmem:[#allocation5 + $0x18] sm:$0xff] %v954_v9   ;;  %v415_v15 = vmul.f32 %v1152_v7, %v1371_v17  ;;  %1161 = vrsqrt.f32 %v294_v58 }
  0xc3   :  { %1163 = vrsqrt.f32 %v293_v51  ;;  %v186_v12 = vpop.xlane.xlu1 %185  ;;  %v184_v31 = vpop.xlane.xlu0 %183 }
  0xc4   :  { %v1154_v47 = vpop.eup %1153  ;;  %v959_v13 = vpack.c.bf16 %v416_v30, %v415_v15  ;;  %v296_v6 = vmax.f32 %v186_v12, 1e-24  ;;  %v295_v46 = vmax.f32 %v184_v31, 1e-24 }
  0xc5   :  { %v1156_v62 = vpop.eup %1155  ;;  %v418_v38 = vmul.f32 %v1154_v47, %v1377_v20 }
  0xc6   :  { %1099 = vst [vmem:[#allocation5 + $0x20] sm:$0xff] %v959_v13   ;;  %v417_v0 = vmul.f32 %v1156_v62, %v1379_v21  ;;  %1165 = vrsqrt.f32 %v296_v6 }
  0xc7   :  { %1167 = vrsqrt.f32 %v295_v46  ;;  %v190_v16 = vpop.xlane.xlu1 %189  ;;  %v188_v1 = vpop.xlane.xlu0 %187 }
  0xc8   :  { %v1158_v2 = vpop.eup %1157  ;;  %v964_v17 = vpack.c.bf16 %v418_v38, %v417_v0  ;;  %v298_v5 = vmax.f32 %v190_v16, 1e-24  ;;  %v297_v59 = vmax.f32 %v188_v1, 1e-24 }
  0xc9   :  { %v1160_v54 = vpop.eup %1159  ;;  %v420_v55 = vmul.f32 %v1158_v2, %v1385_v24 }
  0xca   :  { %1100 = vst [vmem:[#allocation5 + $0x28] sm:$0xff] %v964_v17   ;;  %v419_v63 = vmul.f32 %v1160_v54, %v1387_v25  ;;  %1169 = vrsqrt.f32 %v298_v5 }
  0xcb   :  { %1171 = vrsqrt.f32 %v297_v59  ;;  %v194_v20 = vpop.xlane.xlu1 %193  ;;  %v192_v39 = vpop.xlane.xlu0 %191 }
  0xcc   :  { %v1162_v23 = vpop.eup %1161  ;;  %v969_v21 = vpack.c.bf16 %v420_v55, %v419_v63  ;;  %v300_v8 = vmax.f32 %v194_v20, 1e-24  ;;  %v299_v22 = vmax.f32 %v192_v39, 1e-24 }
  0xcd   :  { %v1164_v14 = vpop.eup %1163  ;;  %v422_v9 = vmul.f32 %v1162_v23, %v1393_v28 }
  0xce   :  { %1101 = vst [vmem:[#allocation5 + $0x30] sm:$0xff] %v969_v21   ;;  %v421_v58 = vmul.f32 %v1164_v14, %v1395_v29  ;;  %1173 = vrsqrt.f32 %v300_v8 }
  0xcf   :  { %1175 = vrsqrt.f32 %v299_v22  ;;  %v198_v24 = vpop.xlane.xlu1 %197  ;;  %v196_v51 = vpop.xlane.xlu0 %195 }
  0xd0   :  { %v1166_v7 = vpop.eup %1165  ;;  %v974_v25 = vpack.c.bf16 %v422_v9, %v421_v58  ;;  %v302_v30 = vmax.f32 %v198_v24, 1e-24  ;;  %v301_v15 = vmax.f32 %v196_v51, 1e-24 }
  0xd1   :  { %v1168_v12 = vpop.eup %1167  ;;  %v424_v31 = vmul.f32 %v1166_v7, %v1401_v32 }
  0xd2   :  { %1102 = vst [vmem:[#allocation5 + $0x38] sm:$0xff] %v974_v25   ;;  %v423_v47 = vmul.f32 %v1168_v12, %v1403_v33  ;;  %1177 = vrsqrt.f32 %v302_v30 }
  0xd3   :  { %1179 = vrsqrt.f32 %v301_v15  ;;  %v202_v28 = vpop.xlane.xlu1 %201  ;;  %v200_v13 = vpop.xlane.xlu0 %199 }
  0xd4   :  { %v1170_v6 = vpop.eup %1169  ;;  %v979_v29 = vpack.c.bf16 %v424_v31, %v423_v47  ;;  %v304_v46 = vmax.f32 %v202_v28, 1e-24  ;;  %v303_v62 = vmax.f32 %v200_v13, 1e-24 }
  0xd5   :  { %v1172_v38 = vpop.eup %1171  ;;  %v426_v0 = vmul.f32 %v1170_v6, %v1409_v36 }
  0xd6   :  { %1103 = vst [vmem:[#allocation5 + $0x40] sm:$0xff] %v979_v29   ;;  %v425_v16 = vmul.f32 %v1172_v38, %v1411_v37  ;;  %1181 = vrsqrt.f32 %v304_v46 }
  0xd7   :  { %1183 = vrsqrt.f32 %v303_v62  ;;  %v206_v32 = vpop.xlane.xlu1 %205  ;;  %v204_v1 = vpop.xlane.xlu0 %203 }
  0xd8   :  { %v1174_v2 = vpop.eup %1173  ;;  %v984_v33 = vpack.c.bf16 %v426_v0, %v425_v16  ;;  %v306_v17 = vmax.f32 %v206_v32, 1e-24  ;;  %v305_v5 = vmax.f32 %v204_v1, 1e-24 }
  0xd9   :  { %v1176_v59 = vpop.eup %1175  ;;  %v428_v54 = vmul.f32 %v1174_v2, %v1417_v40 }
  0xda   :  { %1104 = vst [vmem:[#allocation5 + $0x48] sm:$0xff] %v984_v33   ;;  %v427_v55 = vmul.f32 %v1176_v59, %v1419_v41  ;;  %1185 = vrsqrt.f32 %v306_v17 }
  0xdb   :  { %1187 = vrsqrt.f32 %v305_v5  ;;  %v210_v36 = vpop.xlane.xlu1 %209  ;;  %v208_v63 = vpop.xlane.xlu0 %207 }
  0xdc   :  { %v1178_v20 = vpop.eup %1177  ;;  %v989_v37 = vpack.c.bf16 %v428_v54, %v427_v55  ;;  %v308_v39 = vmax.f32 %v210_v36, 1e-24  ;;  %v307_v23 = vmax.f32 %v208_v63, 1e-24 }
  0xdd   :  { %v1180_v21 = vpop.eup %1179  ;;  %v430_v8 = vmul.f32 %v1178_v20, %v1425_v44 }
  0xde   :  { %1105 = vst [vmem:[#allocation5 + $0x50] sm:$0xff] %v989_v37   ;;  %v429_v22 = vmul.f32 %v1180_v21, %v1427_v45  ;;  %1189 = vrsqrt.f32 %v308_v39 }
  0xdf   :  { %1191 = vrsqrt.f32 %v307_v23  ;;  %v214_v40 = vpop.xlane.xlu1 %213  ;;  %v212_v14 = vpop.xlane.xlu0 %211 }
  0xe0   :  { %v1182_v9 = vpop.eup %1181  ;;  %v994_v41 = vpack.c.bf16 %v430_v8, %v429_v22  ;;  %v310_v58 = vmax.f32 %v214_v40, 1e-24  ;;  %v309_v24 = vmax.f32 %v212_v14, 1e-24 }
  0xe1   :  { %v1184_v51 = vpop.eup %1183  ;;  %v432_v7 = vmul.f32 %v1182_v9, %v1433_v48 }
  0xe2   :  { %1106 = vst [vmem:[#allocation5 + $0x58] sm:$0xff] %v994_v41   ;;  %v431_v25 = vmul.f32 %v1184_v51, %v1435_v49  ;;  %1193 = vrsqrt.f32 %v310_v58 }
  0xe3   :  { %1195 = vrsqrt.f32 %v309_v24  ;;  %v218_v44 = vpop.xlane.xlu1 %217  ;;  %v216_v30 = vpop.xlane.xlu0 %215 }
  0xe4   :  { %v1186_v15 = vpop.eup %1185  ;;  %v999_v45 = vpack.c.bf16 %v432_v7, %v431_v25  ;;  %v312_v12 = vmax.f32 %v218_v44, 1e-24  ;;  %v311_v31 = vmax.f32 %v216_v30, 1e-24 }
  0xe5   :  { %v1188_v47 = vpop.eup %1187  ;;  %v434_v28 = vmul.f32 %v1186_v15, %v1441_v52 }
  0xe6   :  { %1107 = vst [vmem:[#allocation5 + $0x60] sm:$0xff] %v999_v45   ;;  %v433_v13 = vmul.f32 %v1188_v47, %v1443_v53  ;;  %1197 = vrsqrt.f32 %v312_v12 }
  0xe7   :  { %1199 = vrsqrt.f32 %v311_v31  ;;  %v222_v48 = vpop.xlane.xlu1 %221  ;;  %v220_v6 = vpop.xlane.xlu0 %219 }
  0xe8   :  { %v1190_v29 = vpop.eup %1189  ;;  %v1004_v49 = vpack.c.bf16 %v434_v28, %v433_v13  ;;  %v314_v46 = vmax.f32 %v222_v48, 1e-24  ;;  %v313_v62 = vmax.f32 %v220_v6, 1e-24 }
  0xe9   :  { %v1192_v38 = vpop.eup %1191  ;;  %v436_v0 = vmul.f32 %v1190_v29, %v1449_v56 }
  0xea   :  { %1108 = vst [vmem:[#allocation5 + $0x68] sm:$0xff] %v1004_v49   ;;  %v435_v16 = vmul.f32 %v1192_v38, %v1451_v57  ;;  %1201 = vrsqrt.f32 %v314_v46 }
  0xeb   :  { %1203 = vrsqrt.f32 %v313_v62  ;;  %v226_v52 = vpop.xlane.xlu1 %225  ;;  %v224_v32 = vpop.xlane.xlu0 %223 }
  0xec   :  { %v1194_v1 = vpop.eup %1193  ;;  %v1009_v53 = vpack.c.bf16 %v436_v0, %v435_v16  ;;  %v316_v2 = vmax.f32 %v226_v52, 1e-24  ;;  %v315_v33 = vmax.f32 %v224_v32, 1e-24 }
  0xed   :  { %v1196_v17 = vpop.eup %1195  ;;  %v438_v5 = vmul.f32 %v1194_v1, %v1457_v60 }
  0xee   :  { %1109 = vst [vmem:[#allocation5 + $0x70] sm:$0xff] %v1009_v53   ;;  %v437_v59 = vmul.f32 %v1196_v17, %v1459_v61  ;;  %1205 = vrsqrt.f32 %v316_v2 }
  0xef   :  { %1207 = vrsqrt.f32 %v315_v33  ;;  %v230_v56 = vpop.xlane.xlu1 %229  ;;  %v228_v54 = vpop.xlane.xlu0 %227 }
  0xf0   :  { %v1198_v55 = vpop.eup %1197  ;;  %v1014_v57 = vpack.c.bf16 %v438_v5, %v437_v59  ;;  %v318_v36 = vmax.f32 %v230_v56, 1e-24  ;;  %v317_v63 = vmax.f32 %v228_v54, 1e-24  ;;  %v1709_v54 = vld [vmem:[#allocation8_spill] sm:$0xff] }
  0xf1   :  { %v1200_v20 = vpop.eup %1199  ;;  %v440_v37 = vmul.f32 %v1198_v55, %v1465_v3 }
  0xf2   :  { %1110 = vst [vmem:[#allocation5 + $0x78] sm:$0xff] %v1014_v57   ;;  %v439_v39 = vmul.f32 %v1200_v20, %v1467_v4  ;;  %1209 = vrsqrt.f32 %v318_v36 }
  0xf3   :  { %1211 = vrsqrt.f32 %v317_v63  ;;  %v234_v60 = vpop.xlane.xlu1 %233  ;;  %v232_v23 = vpop.xlane.xlu0 %231 }
  0xf4   :  { %v1202_v21 = vpop.eup %1201  ;;  %v1019_v61 = vpack.c.bf16 %v440_v37, %v439_v39  ;;  %v320_v8 = vmax.f32 %v234_v60, 1e-24  ;;  %v319_v22 = vmax.f32 %v232_v23, 1e-24  ;;  %v1710_v39 = vld [vmem:[#allocation9_spill] sm:$0xff]  ;;  %v1711_v23 = vld [vmem:[#allocation10_spill] sm:$0xff] }
  0xf5   :  { %v1204_v40 = vpop.eup %1203  ;;  %v442_v14 = vmul.f32 %v1202_v21, %v1473_v10 }
  0xf6   :  { %1111 = vst [vmem:[#allocation5 + $0x80] sm:$0xff] %v1019_v61   ;;  %v441_v9 = vmul.f32 %v1204_v40, %v1475_v11  ;;  %1213 = vrsqrt.f32 %v320_v8 }
  0xf7   :  { %1215 = vrsqrt.f32 %v319_v22  ;;  %v238_v3 = vpop.xlane.xlu1 %237  ;;  %v236_v41 = vpop.xlane.xlu0 %235 }
  0xf8   :  { %v1206_v58 = vpop.eup %1205  ;;  %v1024_v4 = vpack.c.bf16 %v442_v14, %v441_v9  ;;  %v322_v24 = vmax.f32 %v238_v3, 1e-24  ;;  %v321_v51 = vmax.f32 %v236_v41, 1e-24  ;;  %v1712_v3 = vld [vmem:[#allocation11_spill] sm:$0xff] }
  0xf9   :  { %v1208_v7 = vpop.eup %1207  ;;  %v444_v25 = vmul.f32 %v1206_v58, %v1481_v18  ;;  %v1713_v58 = vld [vmem:[#allocation12_spill] sm:$0xff] }
  0xfa   :  { %1112 = vst [vmem:[#allocation5 + $0x88] sm:$0xff] %v1024_v4   ;;  %v443_v44 = vmul.f32 %v1208_v7, %v1483_v19  ;;  %1217 = vrsqrt.f32 %v322_v24 }
  0xfb   :  { %1219 = vrsqrt.f32 %v321_v51  ;;  %v242_v10 = vpop.xlane.xlu1 %241  ;;  %v240_v30 = vpop.xlane.xlu0 %239 }
  0xfc   :  { %v1210_v15 = vpop.eup %1209  ;;  %v1029_v11 = vpack.c.bf16 %v444_v25, %v443_v44  ;;  %v324_v45 = vmax.f32 %v242_v10, 1e-24  ;;  %v323_v12 = vmax.f32 %v240_v30, 1e-24 }
  0xfd   :  { %v1212_v31 = vpop.eup %1211  ;;  %v446_v47 = vmul.f32 %v1210_v15, %v1489_v26  ;;  %v1714_v15 = vld [vmem:[#allocation13_spill] sm:$0xff] }
  0xfe   :  { %1113 = vst [vmem:[#allocation5 + $0x90] sm:$0xff] %v1029_v11   ;;  %v445_v28 = vmul.f32 %v1212_v31, %v1491_v27  ;;  %1221 = vrsqrt.f32 %v324_v45  ;;  %v1715_v45 = vld [vmem:[#allocation14_spill] sm:$0xff] }
  0xff   :  { %1223 = vrsqrt.f32 %v323_v12  ;;  %v246_v18 = vpop.xlane.xlu1 %245  ;;  %v244_v13 = vpop.xlane.xlu0 %243 }
 0x100   :  { %v1214_v48 = vpop.eup %1213  ;;  %v1034_v19 = vpack.c.bf16 %v446_v47, %v445_v28  ;;  %v326_v6 = vmax.f32 %v246_v18, 1e-24  ;;  %v325_v29 = vmax.f32 %v244_v13, 1e-24 }
 0x101   :  { %v1216_v49 = vpop.eup %1215  ;;  %v448_v46 = vmul.f32 %v1214_v48, %v1497_v34 }
 0x102   :  { %1114 = vst [vmem:[#allocation5 + $0x98] sm:$0xff] %v1034_v19   ;;  %v447_v62 = vmul.f32 %v1216_v49, %v1499_v35  ;;  %1225 = vrsqrt.f32 %v326_v6  ;;  %v1716_v6 = vld [vmem:[#allocation15_spill] sm:$0xff]  ;;  %v1717_v49 = vld [vmem:[#allocation16_spill] sm:$0xff] }
 0x103   :  { %1227 = vrsqrt.f32 %v325_v29  ;;  %v250_v26 = vpop.xlane.xlu1 %249  ;;  %v248_v38 = vpop.xlane.xlu0 %247 }
 0x104   :  { %v1218_v0 = vpop.eup %1217  ;;  %v1039_v27 = vpack.c.bf16 %v448_v46, %v447_v62  ;;  %v328_v16 = vmax.f32 %v250_v26, 1e-24  ;;  %v327_v52 = vmax.f32 %v248_v38, 1e-24 }
 0x105   :  { %v1220_v32 = vpop.eup %1219  ;;  %v450_v1 = vmul.f32 %v1218_v0, %v1505_v42 }
 0x106   :  { %1115 = vst [vmem:[#allocation5 + $0xa0] sm:$0xff] %v1039_v27   ;;  %v449_v53 = vmul.f32 %v1220_v32, %v1507_v43  ;;  %1229 = vrsqrt.f32 %v328_v16  ;;  %v1718_v32 = vld [vmem:[#allocation17_spill] sm:$0xff] }
 0x107   :  { %1231 = vrsqrt.f32 %v327_v52  ;;  %v254_v34 = vpop.xlane.xlu1 %253  ;;  %v252_v2 = vpop.xlane.xlu0 %251 }
 0x108   :  { %v1222_v33 = vpop.eup %1221  ;;  %v1044_v35 = vpack.c.bf16 %v450_v1, %v449_v53  ;;  %v330_v17 = vmax.f32 %v254_v34, 1e-24  ;;  %v329_v5 = vmax.f32 %v252_v2, 1e-24  ;;  %v1719_v53 = vld [vmem:[#allocation18_spill] sm:$0xff] }
 0x109   :  { %v1224_v59 = vpop.eup %1223  ;;  %v452_v56 = vmul.f32 %v1222_v33, %v1513_v50 }
 0x10a   :  { %1116 = vst [vmem:[#allocation5 + $0xa8] sm:$0xff] %v1044_v35   ;;  %v451_v55 = vmul.f32 %v1224_v59, %v1709_v54  ;;  %1233 = vrsqrt.f32 %v330_v17  ;;  %v1720_v54 = vld [vmem:[#allocation19_spill] sm:$0xff] }
 0x10b   :  { %1235 = vrsqrt.f32 %v329_v5  ;;  %v258_v42 = vpop.xlane.xlu1 %257  ;;  %v256_v57 = vpop.xlane.xlu0 %255 }
 0x10c   :  { %v1226_v36 = vpop.eup %1225  ;;  %v1049_v43 = vpack.c.bf16 %v452_v56, %v451_v55  ;;  %v332_v63 = vmax.f32 %v258_v42, 1e-24  ;;  %v331_v20 = vmax.f32 %v256_v57, 1e-24  ;;  %v1721_v42 = vld [vmem:[#allocation20_spill] sm:$0xff] }
 0x10d   :  { %v1228_v37 = vpop.eup %1227  ;;  %v454_v60 = vmul.f32 %v1226_v36, %v1710_v39  ;;  %v1723_v39 = vld [vmem:[#allocation22_spill] sm:$0xff] }
 0x10e   :  { %1117 = vst [vmem:[#allocation5 + $0xb0] sm:$0xff] %v1049_v43   ;;  %v453_v21 = vmul.f32 %v1228_v37, %v1711_v23  ;;  %1237 = vrsqrt.f32 %v332_v63 }
 0x10f   :  { %1239 = vrsqrt.f32 %v331_v20  ;;  %v262_v50 = vpop.xlane.xlu1 %261  ;;  %v260_v61 = vpop.xlane.xlu0 %259  ;;  %v1722_v20 = vld [vmem:[#allocation21_spill] sm:$0xff] }
 0x110   :  { %v1230_v8 = vpop.eup %1229  ;;  %v1054_v22 = vpack.c.bf16 %v454_v60, %v453_v21  ;;  %v334_v40 = vmax.f32 %v262_v50, 1e-24  ;;  %v333_v14 = vmax.f32 %v260_v61, 1e-24  ;;  %v1724_v61 = vld [vmem:[#allocation23_spill] sm:$0xff] }
 0x111   :  { %v1232_v9 = vpop.eup %1231  ;;  %v456_v41 = vmul.f32 %v1230_v8, %v1712_v3 }
 0x112   :  { %1118 = vst [vmem:[#allocation5 + $0xb8] sm:$0xff] %v1054_v22   ;;  %v455_v4 = vmul.f32 %v1232_v9, %v1713_v58  ;;  %1241 = vrsqrt.f32 %v334_v40  ;;  %v1725_v22 = vld [vmem:[#allocation24_spill] sm:$0xff] }
 0x113   :  { %1243 = vrsqrt.f32 %v333_v14  ;;  %v266_v24 = vpop.xlane.xlu1 %265  ;;  %v264_v51 = vpop.xlane.xlu0 %263 }
 0x114   :  { %v1234_v7 = vpop.eup %1233  ;;  %v1059_v25 = vpack.c.bf16 %v456_v41, %v455_v4  ;;  %v336_v44 = vmax.f32 %v266_v24, 1e-24  ;;  %v335_v10 = vmax.f32 %v264_v51, 1e-24  ;;  %v1726_v41 = vld [vmem:[#allocation25_spill] sm:$0xff]  ;;  %v1727_v4 = vld [vmem:[#allocation26_spill] sm:$0xff] }
 0x115   :  { %v1236_v30 = vpop.eup %1235  ;;  %v458_v11 = vmul.f32 %v1234_v7, %v1714_v15 }
 0x116   :  { %1119 = vst [vmem:[#allocation5 + $0xc0] sm:$0xff] %v1059_v25   ;;  %v457_v12 = vmul.f32 %v1236_v30, %v1715_v45  ;;  %1245 = vrsqrt.f32 %v336_v44 }
 0x117   :  { %1247 = vrsqrt.f32 %v335_v10  ;;  %v270_v31 = vpop.xlane.xlu1 %269  ;;  %v268_v47 = vpop.xlane.xlu0 %267 }
 0x118   :  { %v1238_v28 = vpop.eup %1237  ;;  %v1064_v18 = vpack.c.bf16 %v458_v11, %v457_v12  ;;  %v338_v13 = vmax.f32 %v270_v31, 1e-24  ;;  %v337_v48 = vmax.f32 %v268_v47, 1e-24 }
 0x119   :  { %v1240_v19 = vpop.eup %1239  ;;  %v460_v29 = vmul.f32 %v1238_v28, %v1716_v6 }
 0x11a   :  { %1120 = vst [vmem:[#allocation5 + $0xc8] sm:$0xff] %v1064_v18   ;;  %v459_v46 = vmul.f32 %v1240_v19, %v1717_v49  ;;  %1249 = vrsqrt.f32 %v338_v13 }
 0x11b   :  { %1251 = vrsqrt.f32 %v337_v48  ;;  %v274_v62 = vpop.xlane.xlu1 %273  ;;  %v272_v26 = vpop.xlane.xlu0 %271 }
 0x11c   :  { %v1242_v38 = vpop.eup %1241  ;;  %v1069_v0 = vpack.c.bf16 %v460_v29, %v459_v46  ;;  %v340_v27 = vmax.f32 %v274_v62, 1e-24  ;;  %v339_v16 = vmax.f32 %v272_v26, 1e-24 }
 0x11d   :  { %v1244_v52 = vpop.eup %1243  ;;  %v462_v1 = vmul.f32 %v1242_v38, %v1718_v32 }
 0x11e   :  { %1121 = vst [vmem:[#allocation5 + $0xd0] sm:$0xff] %v1069_v0   ;;  %v461_v34 = vmul.f32 %v1244_v52, %v1719_v53  ;;  %1253 = vrsqrt.f32 %v340_v27 }
 0x11f   :  { %1255 = vrsqrt.f32 %v339_v16  ;;  %v278_v2 = vpop.xlane.xlu1 %277  ;;  %v276_v33 = vpop.xlane.xlu0 %275 }
 0x120   :  { %v1246_v35 = vpop.eup %1245  ;;  %v1074_v17 = vpack.c.bf16 %v462_v1, %v461_v34  ;;  %v342_v5 = vmax.f32 %v278_v2, 1e-24  ;;  %v341_v59 = vmax.f32 %v276_v33, 1e-24 }
 0x121   :  { %v1248_v56 = vpop.eup %1247  ;;  %v464_v55 = vmul.f32 %v1246_v35, %v1720_v54 }
 0x122   :  { %1122 = vst [vmem:[#allocation5 + $0xd8] sm:$0xff] %v1074_v17   ;;  %v463_v57 = vmul.f32 %v1248_v56, %v1721_v42  ;;  %1257 = vrsqrt.f32 %v342_v5 }
 0x123   :  { %1259 = vrsqrt.f32 %v341_v59 }
 0x124   :  { %v1250_v36 = vpop.eup %1249  ;;  %v1079_v43 = vpack.c.bf16 %v464_v55, %v463_v57 }
 0x125   :  { %v1252_v63 = vpop.eup %1251  ;;  %v466_v37 = vmul.f32 %v1250_v36, %v1722_v20 }
 0x126   :  { %1123 = vst [vmem:[#allocation5 + $0xe0] sm:$0xff] %v1079_v43   ;;  %v465_v60 = vmul.f32 %v1252_v63, %v1723_v39 }
 0x128   :  { %v1254_v23 = vpop.eup %1253  ;;  %v1084_v21 = vpack.c.bf16 %v466_v37, %v465_v60 }
 0x129   :  { %v1256_v50 = vpop.eup %1255  ;;  %v468_v8 = vmul.f32 %v1254_v23, %v1724_v61 }
 0x12a   :  { %1124 = vst [vmem:[#allocation5 + $0xe8] sm:$0xff] %v1084_v21   ;;  %v467_v40 = vmul.f32 %v1256_v50, %v1725_v22 }
 0x12c   :  { %v1258_v14 = vpop.eup %1257  ;;  %v1089_v9 = vpack.c.bf16 %v468_v8, %v467_v40 }
 0x12d   :  { %v1260_v3 = vpop.eup %1259  ;;  %v470_v58 = vmul.f32 %v1258_v14, %v1726_v41 }
 0x12e   :  { %1125 = vst [vmem:[#allocation5 + $0xf0] sm:$0xff] %v1089_v9   ;;  %v469_v24 = vmul.f32 %v1260_v3, %v1727_v4 }
 0x130   :  { %v1094_v51 = vpack.c.bf16 %v470_v58, %v469_v24 }
 0x132   :  { %1126 = vst [vmem:[#allocation5 + $0xf8] sm:$0xff] %v1094_v51  }
 0x133   :  { %1294 = shalt.err (!%p1291_p12)
}
 0x134   :  { %s1295_s24 = scalar_lea.hbm %s1670_s1, 4096 }
 0x135   :  { %p1296_p13 = scmp.ne.s32.totalorder %s1670_s1, %s1295_s24  ;;  %p1299_p0 = scmp.lt.u32.totalorder %s1295_s24, %s1670_s1 }
 0x137   :  { %p1301_p1 = pnand %p1299_p0, %p1296_p13 }
 0x139   :  { %1304 = shalt.err (!%p1301_p1)
}
 0x13a   :  { %s1313_s29 = smov 64   ;;  %s1314_s30 = smov 4  }
 0x13b   :  { %802 = dma.vmem_to_hbm [thread:$0]  %s797_s20, 4096, %s1670_s1, [#allocation4], %s1313_s29, %s1313_s29, %s1314_s30  }
 0x13c   :  { %1307 = dma.done.wait [#allocation4], 4096  }
 0x13d   :  { %1308 = vsyncadd [#allocation4], 4294963200 }
 0x13e   :  { %806 = vsyncpa [#allocation3], 1 }
 0x13f   :  { %807 = vsyncpa [#allocation4], 1 }

</bundles_post_ra>
